<compile_context>
chip_gen: v7x
topology: tpu7x:2x2x1
jax: 0.10.0
libtpu: 0.0.40
codegen_flags: <defaults>
</compile_context>

<pallas_src>
import functools

import jax
import jax.numpy as jnp
from jax import lax
from jax.experimental import pallas as pl
from jax.experimental.pallas import tpu as pltpu


def _dsc_kernel(x_ref, wdw_ref, wpw_ref, b_ref, col_ref, o_ref, *,
                k, dilation, padding, W, HW, cin, nb):
    """Fused depthwise conv -> 1x1 conv (MXU) -> folded BN bias -> ReLU.

    x_ref   : (Nb, Cin, H*W)  bf16  batch block, flattened spatial on lanes
    wdw_ref : (k*k, Cin, 1)   f32   depthwise weight per tap / channel
    wpw_ref : (Cout, Cin)     bf16  pointwise weights with BN scale folded in
    b_ref   : (Cout, 1)       f32   folded bias (dw bias thru pw, pw bias, BN shift)
    col_ref : (1, H*W)        f32   column index (w) of each flattened position
    o_ref   : (Nb, Cout, H*W) f32
    """
    halo = padding * (W + 1)                         # |most negative tap shift|
    tail = ((k - 1) * dilation - padding) * (W + 1)  # largest positive tap shift

    # Column-validity masks, built once from the tiny column-index operand and
    # reused for every tap / image. Taps with ow == 0 need no mask at all:
    # their row-invalid reads land in the zero halo below.
    col = col_ref[...]                               # (1, HW) f32
    col_masks = {}
    for kw in range(k):
        ow = kw * dilation - padding
        if ow < 0:
            col_masks[kw] = (col < float(W + ow)).astype(jnp.float32)
        elif ow > 0:
            col_masks[kw] = (col >= float(ow)).astype(jnp.float32)

    dws = []
    for i in range(nb):
        x_i = x_ref[i].astype(jnp.float32)           # (Cin, HW) f32 for VPU math
        dw = jnp.zeros((cin, HW), jnp.float32)
        for kw in range(k):
            ow = kw * dilation - padding
            # Source-side pre-mask: wrapped (column-invalid) flat reads hit
            # exactly the zeroed columns; row-invalid reads hit the zero halo.
            xm = x_i * col_masks[kw] if kw in col_masks else x_i
            pieces = []
            if halo > 0:
                pieces.append(jnp.zeros((cin, halo), jnp.float32))
            pieces.append(xm)
            if tail > 0:
                pieces.append(jnp.zeros((cin, tail), jnp.float32))
            xh = jnp.concatenate(pieces, axis=1) if len(pieces) > 1 else xm
            for kh in range(k):
                oh = kh * dilation - padding
                s = oh * W + ow                      # flat shift of this tap
                dw = dw + xh[:, halo + s: halo + s + HW] * wdw_ref[kh * k + kw]
        dws.append(dw.astype(jnp.bfloat16))

    # One native-bf16 MXU matmul for the whole batch block: lanes filled with
    # Nb*HW instead of one tiny push per image; f32 accumulation.
    dw_all = jnp.concatenate(dws, axis=1) if nb > 1 else dws[0]   # (Cin, Nb*HW)
    y = jnp.dot(wpw_ref[...], dw_all, preferred_element_type=jnp.float32)
    # BN(eval) + both conv biases are pre-folded into wpw_ref / b_ref.
    y = jnp.maximum(y + b_ref[...], 0.0)
    for i in range(nb):
        o_ref[i] = y[:, i * HW:(i + 1) * HW].astype(o_ref.dtype)


def _pick_batch_block(N, Cin, Cout, HW):
    """Images per grid step: VMEM-bounded, keeps >=2 grid steps when N >= 2."""
    per_img = Cin * HW * 2 + Cout * HW * 4           # bf16 in + f32 out, bytes
    budget = 8 * 1024 * 1024                          # conservative for v5e/v7x
    cap = max(1, budget // (2 * per_img))             # double-buffered pipeline
    cap = min(cap, 8)                                  # bound in-kernel unroll
    if N >= 2:
        cap = min(cap, N // 2)                         # megacore / pipelining
    nb = 1
    for d in range(1, N + 1):
        if N % d == 0 and d <= cap:
            nb = d
    return nb


def dsc_forward(x_nchw, params, *, kernel_size, padding, dilation):
    """Runs the fused DSC forward pass. x_nchw: (N, Cin, H, W) float32 (NCHW)."""
    k = kernel_size
    if 2 * padding != dilation * (k - 1):
        # TODO(synk): only the 'same'-size configuration (2*padding == dilation*(k-1)),
        # which is how DSC is used in CLNet, is fused here; general output sizes would
        # need 2-D row-tiled shifting instead of the flat-shift trick.
        raise NotImplementedError("fused DSC kernel assumes 'same' spatial size")

    w_dw = params["w_dw"]          # (Cin, 1, k, k)    torch layout
    b_dw = params["b_dw"]          # (Cin,)
    w_pw = params["w_pw"]          # (Cout, Cin, 1, 1) torch layout
    b_pw = params["b_pw"]          # (Cout,)
    gamma, beta = params["gamma"], params["beta"]
    rmean, rvar, eps = params["running_mean"], params["running_var"], params["eps"]

    N, Cin, H, W = x_nchw.shape
    Cout = w_pw.shape[0]
    HW = H * W

    # ---- fold BN(eval) + both biases into the pointwise weights / one bias ----
    # TODO(synk): train-mode BatchNorm (batch statistics) is not implemented;
    #             eval-mode (running stats) semantics are folded here.
    scale = gamma / jnp.sqrt(rvar + eps)                       # (Cout,)
    shift = beta - rmean * scale                               # (Cout,)
    wpw2 = w_pw[:, :, 0, 0]                                    # (Cout, Cin) f32
    wpw_eff = (wpw2 * scale[:, None]).astype(jnp.bfloat16)     # BN scale folded, bf16
    bias_eff = (scale * (wpw2 @ b_dw + b_pw) + shift).reshape(Cout, 1)

    # depthwise weights as per-tap (Cin, 1) columns, tap order t = kh*k + kw
    wdw_taps = jnp.transpose(w_dw[:, 0, :, :].reshape(Cin, k * k),
                             (1, 0)).reshape(k * k, Cin, 1)

    # Tiny column-index operand (1, HW); per-tap masks are derived in-kernel.
    col_idx = jnp.tile(jnp.arange(W, dtype=jnp.float32), H).reshape(1, HW)

    x_flat = x_nchw.astype(jnp.bfloat16).reshape(N, Cin, HW)   # bf16 storage, free reshape

    Nb = _pick_batch_block(N, Cin, Cout, HW)
    assert N % Nb == 0

    kernel = functools.partial(_dsc_kernel, k=k, dilation=dilation,
                               padding=padding, W=W, HW=HW, cin=Cin, nb=Nb)

    cost = pl.CostEstimate(
        flops=2 * (k * k * Cin + Cout * Cin) * HW * N,
        transcendentals=0,
        bytes_accessed=N * HW * (Cin * 2 + Cout * 4)
                       + HW * 4 + (k * k * Cin + Cout * Cin + Cout) * 4,
    )

    # TODO(synk): for large images add a haloed spatial row-tile grid axis so the
    # per-step VMEM footprint stays bounded on v7x (64 MiB) / v5e (16 MiB scoped).
    out_flat = pl.pallas_call(
        kernel,
        out_shape=jax.ShapeDtypeStruct((N, Cout, HW), jnp.float32),
        grid_spec=pltpu.PrefetchScalarGridSpec(
            num_scalar_prefetch=0,
            grid=(N // Nb,),
            in_specs=[
                pl.BlockSpec((Nb, Cin, HW), lambda n: (n, 0, 0)),
                pl.BlockSpec((k * k, Cin, 1), lambda n: (0, 0, 0)),
                pl.BlockSpec((Cout, Cin), lambda n: (0, 0)),
                pl.BlockSpec((Cout, 1), lambda n: (0, 0)),
                pl.BlockSpec((1, HW), lambda n: (0, 0)),
            ],
            out_specs=pl.BlockSpec((Nb, Cout, HW), lambda n: (n, 0, 0)),
        ),
        compiler_params=pltpu.CompilerParams(
            dimension_semantics=("parallel",),
            vmem_limit_bytes=64 * 1024 * 1024),
        cost_estimate=cost,
    )(x_flat, wdw_taps, wpw_eff, bias_eff, col_idx)

    return out_flat.reshape(N, Cout, H, W)                     # free reshape, stays NCHW


def dsc_reference(x_nchw, params, *, kernel_size, padding, dilation):
    """Pure-JAX f32 reference (same eval-mode BN semantics) for validation."""
    w_dw, b_dw = params["w_dw"], params["b_dw"]
    w_pw, b_pw = params["w_pw"], params["b_pw"]
    gamma, beta = params["gamma"], params["beta"]
    rmean, rvar, eps = params["running_mean"], params["running_var"], params["eps"]
    Cin = x_nchw.shape[1]

    dw = lax.conv_general_dilated(
        x_nchw, w_dw,
        window_strides=(1, 1),
        padding=[(padding, padding), (padding, padding)],
        rhs_dilation=(dilation, dilation),
        dimension_numbers=("NCHW", "OIHW", "NCHW"),
        feature_group_count=Cin,
    ) + b_dw[None, :, None, None]

    pw = jnp.einsum("nchw,oc->nohw", dw, w_pw[:, :, 0, 0]) + b_pw[None, :, None, None]
    bn = (pw - rmean[None, :, None, None]) / jnp.sqrt(rvar[None, :, None, None] + eps)
    bn = bn * gamma[None, :, None, None] + beta[None, :, None, None]
    return jnp.maximum(bn, 0.0)


def make_params(key, inchannels, outchannels, kernel_size):
    k0, k1, k2, k3, k4, k5 = jax.random.split(key, 6)
    fan_dw = (inchannels // inchannels) * kernel_size * kernel_size  # groups=inchannels
    fan_pw = inchannels
    params = {
        "w_dw": jax.random.uniform(k0, (inchannels, 1, kernel_size, kernel_size),
                                   jnp.float32, -1.0, 1.0) / jnp.sqrt(fan_dw),
        "b_dw": jax.random.uniform(k1, (inchannels,), jnp.float32, -1.0, 1.0)
                / jnp.sqrt(fan_dw),
        "w_pw": jax.random.uniform(k2, (outchannels, inchannels, 1, 1),
                                   jnp.float32, -1.0, 1.0) / jnp.sqrt(fan_pw),
        "b_pw": jax.random.uniform(k3, (outchannels,), jnp.float32, -1.0, 1.0)
                / jnp.sqrt(fan_pw),
        "gamma": 1.0 + 0.1 * jax.random.normal(k4, (outchannels,), jnp.float32),
        "beta": 0.1 * jax.random.normal(k5, (outchannels,), jnp.float32),
        "running_mean": jnp.zeros((outchannels,), jnp.float32),
        "running_var": jnp.ones((outchannels,), jnp.float32),
        "eps": jnp.float32(1e-5),
    }
    return params


if __name__ == "__main__":
    # DSC(inchannels=4, outchannels=8, kenelsize=3, padding=1, dilation=1)
    # applied to a (2, 4, 16, 16) NCHW input.
    N, Cin, Cout, H, W = 2, 4, 8, 16, 16
    K, PAD, DIL = 3, 1, 1

    key = jax.random.PRNGKey(0)
    kx, kp = jax.random.split(key)
    x = jax.random.normal(kx, (N, Cin, H, W), jnp.float32)
    params = make_params(kp, Cin, Cout, K)

    out = dsc_forward(x, params, kernel_size=K, padding=PAD, dilation=DIL)
    out = jax.block_until_ready(out)

    ref = dsc_reference(x, params, kernel_size=K, padding=PAD, dilation=DIL)
    assert out.shape == (N, Cout, H, W), out.shape
    # bf16 storage / bf16 MXU pass -> looser tolerance vs. the pure-f32 reference.
    assert jnp.allclose(out, ref, rtol=8e-2, atol=8e-2), float(jnp.max(jnp.abs(out - ref)))

    print("KERNEL_OK")
</pallas_src>

<mosaic_0001>
module attributes {stable_mosaic.version = 11 : i64} {
  func.func @_dsc_kernel(%arg0: i32, %arg1: memref<1x4x256xbf16, #tpu.memory_space<vmem>>, %arg2: memref<9x4x1xf32, #tpu.memory_space<vmem>>, %arg3: memref<8x4xbf16, #tpu.memory_space<vmem>>, %arg4: memref<8x1xf32, #tpu.memory_space<vmem>>, %arg5: memref<1x256xf32, #tpu.memory_space<vmem>>, %arg6: memref<1x8x256xf32, #tpu.memory_space<vmem>>) attributes {dimension_semantics = [#tpu.dimension_semantics<parallel>], iteration_bounds = array<i64: 2>, scalar_prefetch = 0 : i64, scratch_operands = 0 : i64, tpu.core_type = #tpu.core_type<tc>, window_params = [{transform_indices = @transform_0, window_bounds = array<i64: 1, 4, 256>}, {pipeline_mode = #tpu.pipeline_mode<synchronous>, transform_indices = @transform_1, window_bounds = array<i64: 9, 4, 1>}, {pipeline_mode = #tpu.pipeline_mode<synchronous>, transform_indices = @transform_2, window_bounds = array<i64: 8, 4>}, {pipeline_mode = #tpu.pipeline_mode<synchronous>, transform_indices = @transform_3, window_bounds = array<i64: 8, 1>}, {pipeline_mode = #tpu.pipeline_mode<synchronous>, transform_indices = @transform_4, window_bounds = array<i64: 1, 256>}, {transform_indices = @transform_5, window_bounds = array<i64: 1, 8, 256>}]} {
    %c0 = arith.constant 0 : index
    %c0_0 = arith.constant 0 : index
    %0 = vector.load %arg5[%c0, %c0_0] : memref<1x256xf32, #tpu.memory_space<vmem>>, vector<1x256xf32>
    %cst = arith.constant 1.500000e+01 : f32
    %1 = vector.broadcast %cst : f32 to vector<1x256xf32>
    %2 = arith.cmpf olt, %0, %1 : vector<1x256xf32>
    %3 = arith.extui %2 : vector<1x256xi1> to vector<1x256xi32>
    %4 = arith.sitofp %3 : vector<1x256xi32> to vector<1x256xf32>
    %cst_1 = arith.constant 1.000000e+00 : f32
    %5 = vector.broadcast %cst_1 : f32 to vector<1x256xf32>
    %6 = arith.cmpf oge, %0, %5 : vector<1x256xf32>
    %7 = arith.extui %6 : vector<1x256xi1> to vector<1x256xi32>
    %8 = arith.sitofp %7 : vector<1x256xi32> to vector<1x256xf32>
    %c0_2 = arith.constant 0 : index
    %c0_3 = arith.constant 0 : index
    %c0_4 = arith.constant 0 : index
    %9 = vector.load %arg1[%c0_2, %c0_3, %c0_4] : memref<1x4x256xbf16, #tpu.memory_space<vmem>>, vector<1x4x256xbf16>
    %10 = vector.shape_cast %9 : vector<1x4x256xbf16> to vector<4x256xbf16>
    %11 = arith.extf %10 : vector<4x256xbf16> to vector<4x256xf32>
    %cst_5 = arith.constant 0.000000e+00 : f32
    %12 = vector.broadcast %cst_5 : f32 to vector<4x256xf32>
    %13 = vector.broadcast %4 : vector<1x256xf32> to vector<4x256xf32>
    %14 = arith.mulf %11, %13 : vector<4x256xf32>
    %cst_6 = arith.constant 0.000000e+00 : f32
    %15 = vector.broadcast %cst_6 : f32 to vector<4x17xf32>
    %cst_7 = arith.constant 0.000000e+00 : f32
    %16 = vector.broadcast %cst_7 : f32 to vector<4x17xf32>
    %17 = tpu.concatenate %15, %14, %16 in 1 : vector<4x17xf32>, vector<4x256xf32>, vector<4x17xf32> -> vector<4x290xf32>
    %18 = vector.extract_strided_slice %17 {offsets = [0, 0], sizes = [4, 256], strides = [1, 1]} : vector<4x290xf32> to vector<4x256xf32>
    %c0_8 = arith.constant 0 : index
    %c0_9 = arith.constant 0 : index
    %c0_10 = arith.constant 0 : index
    %19 = vector.load %arg2[%c0_8, %c0_9, %c0_10] : memref<9x4x1xf32, #tpu.memory_space<vmem>>, vector<1x4x1xf32>
    %20 = vector.shape_cast %19 : vector<1x4x1xf32> to vector<4x1xf32>
    %21 = vector.broadcast %20 : vector<4x1xf32> to vector<4x256xf32>
    %22 = arith.mulf %18, %21 : vector<4x256xf32>
    %23 = arith.addf %12, %22 : vector<4x256xf32>
    %24 = vector.extract_strided_slice %17 {offsets = [0, 16], sizes = [4, 256], strides = [1, 1]} : vector<4x290xf32> to vector<4x256xf32>
    %c3 = arith.constant 3 : index
    %c0_11 = arith.constant 0 : index
    %c0_12 = arith.constant 0 : index
    %25 = vector.load %arg2[%c3, %c0_11, %c0_12] : memref<9x4x1xf32, #tpu.memory_space<vmem>>, vector<1x4x1xf32>
    %26 = vector.shape_cast %25 : vector<1x4x1xf32> to vector<4x1xf32>
    %27 = vector.broadcast %26 : vector<4x1xf32> to vector<4x256xf32>
    %28 = arith.mulf %24, %27 : vector<4x256xf32>
    %29 = arith.addf %23, %28 : vector<4x256xf32>
    %30 = vector.extract_strided_slice %17 {offsets = [0, 32], sizes = [4, 256], strides = [1, 1]} : vector<4x290xf32> to vector<4x256xf32>
    %c6 = arith.constant 6 : index
    %c0_13 = arith.constant 0 : index
    %c0_14 = arith.constant 0 : index
    %31 = vector.load %arg2[%c6, %c0_13, %c0_14] : memref<9x4x1xf32, #tpu.memory_space<vmem>>, vector<1x4x1xf32>
    %32 = vector.shape_cast %31 : vector<1x4x1xf32> to vector<4x1xf32>
    %33 = vector.broadcast %32 : vector<4x1xf32> to vector<4x256xf32>
    %34 = arith.mulf %30, %33 : vector<4x256xf32>
    %35 = arith.addf %29, %34 : vector<4x256xf32>
    %cst_15 = arith.constant 0.000000e+00 : f32
    %36 = vector.broadcast %cst_15 : f32 to vector<4x17xf32>
    %cst_16 = arith.constant 0.000000e+00 : f32
    %37 = vector.broadcast %cst_16 : f32 to vector<4x17xf32>
    %38 = tpu.concatenate %36, %11, %37 in 1 : vector<4x17xf32>, vector<4x256xf32>, vector<4x17xf32> -> vector<4x290xf32>
    %39 = vector.extract_strided_slice %38 {offsets = [0, 1], sizes = [4, 256], strides = [1, 1]} : vector<4x290xf32> to vector<4x256xf32>
    %c1 = arith.constant 1 : index
    %c0_17 = arith.constant 0 : index
    %c0_18 = arith.constant 0 : index
    %40 = vector.load %arg2[%c1, %c0_17, %c0_18] : memref<9x4x1xf32, #tpu.memory_space<vmem>>, vector<1x4x1xf32>
    %41 = vector.shape_cast %40 : vector<1x4x1xf32> to vector<4x1xf32>
    %42 = vector.broadcast %41 : vector<4x1xf32> to vector<4x256xf32>
    %43 = arith.mulf %39, %42 : vector<4x256xf32>
    %44 = arith.addf %35, %43 : vector<4x256xf32>
    %45 = vector.extract_strided_slice %38 {offsets = [0, 17], sizes = [4, 256], strides = [1, 1]} : vector<4x290xf32> to vector<4x256xf32>
    %c4 = arith.constant 4 : index
    %c0_19 = arith.constant 0 : index
    %c0_20 = arith.constant 0 : index
    %46 = vector.load %arg2[%c4, %c0_19, %c0_20] : memref<9x4x1xf32, #tpu.memory_space<vmem>>, vector<1x4x1xf32>
    %47 = vector.shape_cast %46 : vector<1x4x1xf32> to vector<4x1xf32>
    %48 = vector.broadcast %47 : vector<4x1xf32> to vector<4x256xf32>
    %49 = arith.mulf %45, %48 : vector<4x256xf32>
    %50 = arith.addf %44, %49 : vector<4x256xf32>
    %51 = vector.extract_strided_slice %38 {offsets = [0, 33], sizes = [4, 256], strides = [1, 1]} : vector<4x290xf32> to vector<4x256xf32>
    %c7 = arith.constant 7 : index
    %c0_21 = arith.constant 0 : index
    %c0_22 = arith.constant 0 : index
    %52 = vector.load %arg2[%c7, %c0_21, %c0_22] : memref<9x4x1xf32, #tpu.memory_space<vmem>>, vector<1x4x1xf32>
    %53 = vector.shape_cast %52 : vector<1x4x1xf32> to vector<4x1xf32>
    %54 = vector.broadcast %53 : vector<4x1xf32> to vector<4x256xf32>
    %55 = arith.mulf %51, %54 : vector<4x256xf32>
    %56 = arith.addf %50, %55 : vector<4x256xf32>
    %57 = vector.broadcast %8 : vector<1x256xf32> to vector<4x256xf32>
    %58 = arith.mulf %11, %57 : vector<4x256xf32>
    %cst_23 = arith.constant 0.000000e+00 : f32
    %59 = vector.broadcast %cst_23 : f32 to vector<4x17xf32>
    %cst_24 = arith.constant 0.000000e+00 : f32
    %60 = vector.broadcast %cst_24 : f32 to vector<4x17xf32>
    %61 = tpu.concatenate %59, %58, %60 in 1 : vector<4x17xf32>, vector<4x256xf32>, vector<4x17xf32> -> vector<4x290xf32>
    %62 = vector.extract_strided_slice %61 {offsets = [0, 2], sizes = [4, 256], strides = [1, 1]} : vector<4x290xf32> to vector<4x256xf32>
    %c2 = arith.constant 2 : index
    %c0_25 = arith.constant 0 : index
    %c0_26 = arith.constant 0 : index
    %63 = vector.load %arg2[%c2, %c0_25, %c0_26] : memref<9x4x1xf32, #tpu.memory_space<vmem>>, vector<1x4x1xf32>
    %64 = vector.shape_cast %63 : vector<1x4x1xf32> to vector<4x1xf32>
    %65 = vector.broadcast %64 : vector<4x1xf32> to vector<4x256xf32>
    %66 = arith.mulf %62, %65 : vector<4x256xf32>
    %67 = arith.addf %56, %66 : vector<4x256xf32>
    %68 = vector.extract_strided_slice %61 {offsets = [0, 18], sizes = [4, 256], strides = [1, 1]} : vector<4x290xf32> to vector<4x256xf32>
    %c5 = arith.constant 5 : index
    %c0_27 = arith.constant 0 : index
    %c0_28 = arith.constant 0 : index
    %69 = vector.load %arg2[%c5, %c0_27, %c0_28] : memref<9x4x1xf32, #tpu.memory_space<vmem>>, vector<1x4x1xf32>
    %70 = vector.shape_cast %69 : vector<1x4x1xf32> to vector<4x1xf32>
    %71 = vector.broadcast %70 : vector<4x1xf32> to vector<4x256xf32>
    %72 = arith.mulf %68, %71 : vector<4x256xf32>
    %73 = arith.addf %67, %72 : vector<4x256xf32>
    %74 = vector.extract_strided_slice %61 {offsets = [0, 34], sizes = [4, 256], strides = [1, 1]} : vector<4x290xf32> to vector<4x256xf32>
    %c8 = arith.constant 8 : index
    %c0_29 = arith.constant 0 : index
    %c0_30 = arith.constant 0 : index
    %75 = vector.load %arg2[%c8, %c0_29, %c0_30] : memref<9x4x1xf32, #tpu.memory_space<vmem>>, vector<1x4x1xf32>
    %76 = vector.shape_cast %75 : vector<1x4x1xf32> to vector<4x1xf32>
    %77 = vector.broadcast %76 : vector<4x1xf32> to vector<4x256xf32>
    %78 = arith.mulf %74, %77 : vector<4x256xf32>
    %79 = arith.addf %73, %78 : vector<4x256xf32>
    %80 = arith.truncf %79 : vector<4x256xf32> to vector<4x256xbf16>
    %c0_31 = arith.constant 0 : index
    %c0_32 = arith.constant 0 : index
    %81 = vector.load %arg3[%c0_31, %c0_32] : memref<8x4xbf16, #tpu.memory_space<vmem>>, vector<8x4xbf16>
    %cst_33 = arith.constant dense<0.000000e+00> : vector<8x256xf32>
    %82 = tpu.matmul %81, %80, %cst_33 {dimension_numbers = #tpu.dot_dimension_numbers<[1], [0], [0], [1], [0, 0, 1, 1], [], []>} : vector<8x4xbf16>, vector<4x256xbf16>, vector<8x256xf32> -> vector<8x256xf32>
    %c0_34 = arith.constant 0 : index
    %c0_35 = arith.constant 0 : index
    %83 = vector.load %arg4[%c0_34, %c0_35] : memref<8x1xf32, #tpu.memory_space<vmem>>, vector<8x1xf32>
    %84 = vector.broadcast %83 : vector<8x1xf32> to vector<8x256xf32>
    %85 = arith.addf %82, %84 : vector<8x256xf32>
    %cst_36 = arith.constant 0.000000e+00 : f32
    %86 = vector.broadcast %cst_36 : f32 to vector<8x256xf32>
    %87 = arith.maximumf %85, %86 : vector<8x256xf32>
    %c0_37 = arith.constant 0 : index
    %c0_38 = arith.constant 0 : index
    %c0_39 = arith.constant 0 : index
    %88 = vector.load %arg6[%c0_37, %c0_38, %c0_39] : memref<1x8x256xf32, #tpu.memory_space<vmem>>, vector<1x8x256xf32>
    %89 = vector.shape_cast %88 : vector<1x8x256xf32> to vector<8x256xf32>
    %90 = vector.shape_cast %87 : vector<8x256xf32> to vector<1x8x256xf32>
    tpu.vector_store %arg6[%c0_37, %c0_38, %c0_39], %90 {strides = array<i32>} : memref<1x8x256xf32, #tpu.memory_space<vmem>>, vector<1x8x256xf32>,
    return
  }
  func.func @transform_0(%arg0: i32) -> (i32, i32, i32) {
    %c0_i32 = arith.constant 0 : i32
    %c0_i32_0 = arith.constant 0 : i32
    %c0_i32_1 = arith.constant 0 : i32
    return %arg0, %c0_i32, %c0_i32_0 : i32, i32, i32
  }
  func.func @transform_1(%arg0: i32) -> (i32, i32, i32) {
    %c0_i32 = arith.constant 0 : i32
    %c0_i32_0 = arith.constant 0 : i32
    %c0_i32_1 = arith.constant 0 : i32
    %c0_i32_2 = arith.constant 0 : i32
    return %c0_i32, %c0_i32_0, %c0_i32_1 : i32, i32, i32
  }
  func.func @transform_2(%arg0: i32) -> (i32, i32) {
    %c0_i32 = arith.constant 0 : i32
    %c0_i32_0 = arith.constant 0 : i32
    %c0_i32_1 = arith.constant 0 : i32
    return %c0_i32, %c0_i32_0 : i32, i32
  }
  func.func @transform_3(%arg0: i32) -> (i32, i32) {
    %c0_i32 = arith.constant 0 : i32
    %c0_i32_0 = arith.constant 0 : i32
    %c0_i32_1 = arith.constant 0 : i32
    return %c0_i32, %c0_i32_0 : i32, i32
  }
  func.func @transform_4(%arg0: i32) -> (i32, i32) {
    %c0_i32 = arith.constant 0 : i32
    %c0_i32_0 = arith.constant 0 : i32
    %c0_i32_1 = arith.constant 0 : i32
    return %c0_i32, %c0_i32_0 : i32, i32
  }
  func.func @transform_5(%arg0: i32) -> (i32, i32, i32) {
    %c0_i32 = arith.constant 0 : i32
    %c0_i32_0 = arith.constant 0 : i32
    %c0_i32_1 = arith.constant 0 : i32
    return %arg0, %c0_i32, %c0_i32_0 : i32, i32, i32
  }
}

</mosaic_0001>

<bundles_post_ra>
// kernel: tpu_custom_call.1
= control target key start
LH: loop header
LB: loop body
LE: loop exit
PB: predicated region body
PF: predicated region fallthrough
CT: control target
= control target key end

     0   :  { %10 = vsyncpa [#allocation3], 0  ;;  %s1484_s0 = inlined_call_operand.hbm [shape: bf16[2,4,256], index: 0, kind: input, shape index: {}]   ;;  %s1485_s1 = inlined_call_operand.hbm [shape: f32[9,4,1], index: 1, kind: input, shape index: {}]   ;;  %s1486_s2 = inlined_call_operand.hbm [shape: bf16[8,4], index: 2, kind: input, shape index: {}]   ;;  %s1487_s3 = inlined_call_operand.hbm [shape: f32[8,1], index: 3, kind: input, shape index: {}]   ;;  %s1488_s4 = inlined_call_operand.hbm [shape: f32[1,256], index: 4, kind: input, shape index: {}]   ;;  %s1489_s5 = inlined_call_operand.hbm [shape: f32[2,8,256], index: 5, kind: output, shape index: {}]  }
   0x1   :  { %12 = vsyncpa [#allocation3 + $0x1], 0 }
   0x2   :  { %13 = vsyncpa [#allocation6], 0 }
   0x3   :  { %14 = vsyncpa [#allocation9], 0 }
   0x4   :  { %15 = vsyncpa [#allocation4], 0 }
   0x5   :  { %17 = vsyncpa [#allocation4 + $0x1], 0  ;;  %s1172_s18 = smov 0   ;;  %s1174_s19 = smov 0  }
   0x6   :  { %s1176_s20 = smov 0   ;;  %s1178_s21 = smov 0  }
   0x7 LB: > { %s1123_s22 = smov [#allocation5]   ;;  %s1193_s24 = sadd.s32 4294967295, %s1121_s21   ;;  %s1121_s21 = sphi %s1178_s21, %s1513_s21   ;;  %s1117_s20 = sphi %s1176_s20, %s1512_s20   ;;  %s1113_s19 = sphi %s1174_s19, %s1511_s19   ;;  %s1109_s18 = sphi %s1172_s18, %s1510_s18  }
   0x8   : > { %s176_s23 = sshll.u32 %s1123_s22, 4  ;;  %p771_p0 = scmp.ge.s32.totalorder %s1121_s21, 1  ;;  %s1198_s23 = int_to_ptr.vmem [resolvable:$true] %s176_s23 }
   0x9   : > { %p1490_p1 = scmp.eq.s32.totalorder %s1193_s24, 0  ;;  %p164_p2 = scmp.lt.s32.totalorder %s1121_s21, 3 }
   0xa   : > { %s1124_s26 = smov [#allocation8]   ;;  %s1125_s29 = smov [#allocation7]  }
   0xb   : > { %p1200_p3 = pnand %p771_p0, %p164_p2  ;;  %s201_s27 = sshll.u32 %s1124_s26, 4  ;;  %s1213_s27 = int_to_ptr.vmem [resolvable:$true] %s201_s27 }
   0xc   : > { %s190_s30 = sshll.u32 %s1125_s29, 4  ;;  %s905_s8 = scalar_lea.hbm %s1485_s1, 576  ;;  %s1215_s30 = int_to_ptr.vmem [resolvable:$true] %s190_s30 }
   0xd   : > { %s1493_s25 = scalar_select %p1200_p3, 1, 0 }
   0xe   : > { %p818_p5 = pneg %p1200_p3  ;;  %p906_p7 = scmp.ne.s32.totalorder %s1485_s1, %s905_s8 }
   0xf   : > { %p912_p11 = scmp.lt.u32.totalorder %s905_s8, %s1485_s1 }
  0x10   : > { %p1209_p6 = pnand %p818_p5, %p1490_p1 }
  0x12   : > { %p1225_p8 = pneg %p1209_p6 }
  0x14   : > { %p908_p9 = pnand %p1225_p8, %p906_p7 }
  0x16   : > { %p909_p10 = pneg %p908_p9 }
  0x18   : > { %p914_p12 = pnand %p912_p11, %p909_p10 }
  0x1a   : > { %917 = shalt.err (!%p914_p12)
}
  0x1b   : > { %s918_s14 = scalar_lea.vmem %s1198_s23, 576  ;;  %p926_p5 = scmp.lt.s32.totalorder %s1198_s23, %s1198_s23 }
  0x1c   : > { %p919_p13 = scmp.ne.s32.totalorder %s1198_s23, %s918_s14  ;;  %p927_p4 = scmp.lt.s32.totalorder %s918_s14, %s918_s14 }
  0x1e   : > { %p921_p0 = pnand %p919_p13, %p1225_p8  ;;  %p928_p7 = por %p927_p4, %p926_p5 }
  0x20   : > { %p922_p2 = pneg %p921_p0 }
  0x22   : > { %p929_p9 = pnand %p928_p7, %p922_p2 }
  0x24   : > { %932 = shalt.err (!%p929_p9)
}
  0x25   : > { %s1126_s15 = smov 64   ;;  %s1127_s16 = smov 4  }
  0x26   : > { %821 = dma.hbm_to_vmem [thread:$0]  (!%p1209_p6), %s1485_s1, 576, %s1198_s23, [#allocation6], %s1126_s15, %s1126_s15, %s1127_s16  }
  0x27   : > { %s933_s6 = scalar_lea.hbm %s1487_s3, 128 }
  0x28   : > { %p934_p4 = scmp.ne.s32.totalorder %s1487_s3, %s933_s6  ;;  %p940_p12 = scmp.lt.u32.totalorder %s933_s6, %s1487_s3 }
  0x2a   : > { %p936_p10 = pnand %p934_p4, %p1225_p8 }
  0x2c   : > { %p937_p11 = pneg %p936_p10 }
  0x2e   : > { %p942_p13 = pnand %p940_p12, %p937_p11 }
  0x30   : > { %945 = shalt.err (!%p942_p13)
}
  0x31   : > { %s946_s23 = scalar_lea.vmem %s1213_s27, 128  ;;  %p954_p7 = scmp.lt.s32.totalorder %s1213_s27, %s1213_s27 }
  0x32   : > { %p947_p0 = scmp.ne.s32.totalorder %s1213_s27, %s946_s23  ;;  %p955_p9 = scmp.lt.s32.totalorder %s946_s23, %s946_s23 }
  0x34   : > { %p949_p2 = pnand %p947_p0, %p1225_p8  ;;  %p956_p4 = por %p955_p9, %p954_p7 }
  0x36   : > { %p950_p5 = pneg %p949_p2 }
  0x38   : > { %p957_p10 = pnand %p956_p4, %p950_p5 }
  0x3a   : > { %960 = shalt.err (!%p957_p10)
}
  0x3b   : > { %827 = dma.hbm_to_vmem [thread:$0]  (!%p1209_p6), %s1487_s3, 128, %s1213_s27, [#allocation9]  }
  0x3c   : > { %s961_s16 = scalar_lea.hbm %s1486_s2, 64 }
  0x3d   : > { %p962_p11 = scmp.ne.s32.totalorder %s1486_s2, %s961_s16  ;;  %p968_p0 = scmp.lt.u32.totalorder %s961_s16, %s1486_s2 }
  0x3f   : > { %p964_p12 = pnand %p962_p11, %p1225_p8 }
  0x41   : > { %p965_p13 = pneg %p964_p12 }
  0x43   : > { %p970_p2 = pnand %p968_p0, %p965_p13 }
  0x45   : > { %973 = shalt.err (!%p970_p2)
}
  0x46   : > { %s974_s27 = scalar_lea.vmem %s1215_s30, 64  ;;  %p982_p4 = scmp.lt.s32.totalorder %s1215_s30, %s1215_s30 }
  0x47   : > { %p975_p5 = scmp.ne.s32.totalorder %s1215_s30, %s974_s27  ;;  %p983_p10 = scmp.lt.s32.totalorder %s974_s27, %s974_s27 }
  0x49   : > { %p977_p7 = pnand %p975_p5, %p1225_p8  ;;  %p984_p11 = por %p983_p10, %p982_p4 }
  0x4b   : > { %p978_p9 = pneg %p977_p7 }
  0x4d   : > { %p985_p12 = pnand %p984_p11, %p978_p9 }
  0x4f   : > { %988 = shalt.err (!%p985_p12)
}
  0x50   : > { %824 = dma.hbm_to_vmem [thread:$0]  (!%p1209_p6), %s1486_s2, 64, %s1215_s30, [#allocation6]  }
  0x51   : > { %s1128_s8 = smov [#allocation10]   ;;  %s989_s12 = scalar_lea.hbm %s1488_s4, 32 }
  0x52   : > { %s212_s9 = sshll.u32 %s1128_s8, 4  ;;  %p990_p13 = scmp.ne.s32.totalorder %s1488_s4, %s989_s12  ;;  %s213_s9 = int_to_ptr.vmem [resolvable:$true] %s212_s9 }
  0x53   : > { %p996_p5 = scmp.lt.u32.totalorder %s989_s12, %s1488_s4 }
  0x54   : > { %p992_p0 = pnand %p990_p13, %p1225_p8 }
  0x56   : > { %p993_p2 = pneg %p992_p0 }
  0x58   : > { %p998_p7 = pnand %p996_p5, %p993_p2 }
  0x5a   : > { %1001 = shalt.err (!%p998_p7)
}
  0x5b   : > { %s1002_s30 = scalar_lea.vmem %s213_s9, 32  ;;  %p1010_p11 = scmp.lt.s32.totalorder %s213_s9, %s213_s9 }
  0x5c   : > { %p1003_p9 = scmp.ne.s32.totalorder %s213_s9, %s1002_s30  ;;  %p1011_p12 = scmp.lt.s32.totalorder %s1002_s30, %s1002_s30 }
  0x5e   : > { %p1005_p4 = pnand %p1003_p9, %p1225_p8  ;;  %p1012_p1 = por %p1011_p12, %p1010_p11 }
  0x60   : > { %p1006_p10 = pneg %p1005_p4 }
  0x62   : > { %p1013_p3 = pnand %p1012_p1, %p1006_p10 }
  0x64   : > { %1016 = shalt.err (!%p1013_p3)
}
  0x65   : > { %830 = dma.hbm_to_vmem [thread:$0]  (!%p1209_p6), %s1488_s4, 32, %s213_s9, [#allocation9]  }
  0x66   : > { %s770_s11 = sadd.s32 4294967294, %s1121_s21   ;;  %s1312_s28 = sadd.s32 1, %s1121_s21  }
  0x67   : > { %s27_s26 = ssub.s32 %s1121_s21, %s1312_s28  ;;  %s30_s29 = sadd.s32 1, %s1117_s20 }
  0x68   : > { %p28_p1 = scmp.eq.s32.totalorder %s27_s26, 0  ;;  %p37_p3 = scmp.ne.s32.totalorder %s1117_s20, %s1113_s19 }
  0x69   : > { %p38_p8 = scmp.eq.s32.totalorder %s1121_s21, 0  ;;  %p43_p13 = scmp.ne.s32.totalorder %s1113_s19, %s1109_s18 }
  0x6a   : > { %s1323_s27 = scalar_select %p28_p1, %s1117_s20, %s30_s29  }
  0x6b   : > { %p1325_p0 = por %p38_p8, %p37_p3  ;;  %p1497_p2 = scmp.eq.s32.totalorder %s1193_s24, 0 }
  0x6c   : > { %p151_p5 = scmp.eq.s32.totalorder %s1193_s24, 1  ;;  %p157_p7 = scmp.eq.s32.totalorder %s770_s11, 1 }
  0x6d   : > { %p1331_p6 = por %p1497_p2, %p43_p13  ;;  %p843_p9 = scmp.lt.s32.totalorder %s1121_s21, 2 }
  0x6e   : > { %s223_s8 = sand.u32 1, %s1117_s20   ;;  %p1338_p4 = por %p151_p5, %p37_p3 }
  0x6f   : > { %p1342_p10 = por %p157_p7, %p43_p13  ;;  %s777_s23 = sshll.u32 %s223_s8, 2 }
  0x70   : > { %s1499_s9 = scalar_select %p1338_p4, 1, 0 }
  0x71   : > { %s1500_s10 = scalar_select %p1342_p10, 1, 0 }
  0x72   : > { %s796_s12 = sshll.u32 %s1121_s21, 6  ;;  %s227_s16 = scalar_lea.vmem [#allocation2], %s777_s23 }
  0x73   : > { %s1350_s15 = scalar_lea.hbm %s1484_s0, %s796_s12  ;;  %s235_s30 = sshll.u32 %s227_s16, 4  ;;  %s1352_s30 = int_to_ptr.vmem [resolvable:$true] %s235_s30 }
  0x74   : > { %p1356_p11 = pnand %p843_p9, %p1325_p0  ;;  %s224_s22 = scalar_lea.sflag [#allocation3], %s223_s8 }
  0x75   : > { %s1017_s11 = scalar_lea.hbm %s1350_s15, 64  ;;  %s1022_s23 = scalar_lea.hbm %s1484_s0, 128 }
  0x76   : > { %p1018_p12 = scmp.ne.s32.totalorder %s1350_s15, %s1017_s11  ;;  %p1019_p1 = pneg %p1356_p11 }
  0x77   : > { %p1023_p13 = scmp.lt.u32.totalorder %s1350_s15, %s1484_s0  ;;  %p1024_p0 = scmp.lt.u32.totalorder %s1022_s23, %s1017_s11 }
  0x78   : > { %p1020_p3 = pnand %p1019_p1, %p1018_p12  ;;  %p1026_p5 = scmp.lt.u32.totalorder %s1017_s11, %s1350_s15 }
  0x79   : > { %p1025_p2 = por %p1024_p0, %p1023_p13 }
  0x7a   : > { %p1021_p8 = pneg %p1020_p3 }
  0x7b   : > { %p1027_p7 = por %p1026_p5, %p1025_p2 }
  0x7d   : > { %p1028_p9 = pnand %p1027_p7, %p1021_p8 }
  0x7f   : > { %1031 = shalt.err (!%p1028_p9)
}
  0x80   : > { %s1032_s8 = scalar_lea.vmem %s1352_s30, 64  ;;  %s1129_s13 = smov [#allocation2]  }
  0x81   : > { %p1033_p12 = scmp.ne.s32.totalorder %s1352_s30, %s1032_s8  ;;  %s1037_s14 = sshll.u32 %s1129_s13, 4  ;;  %s1038_s14 = int_to_ptr.vmem [resolvable:$false] %s1037_s14 }
  0x82   : > { %s1039_s16 = scalar_lea.vmem %s1038_s14, 128  ;;  %p1040_p4 = scmp.lt.s32.totalorder %s1352_s30, %s1038_s14 }
  0x83   : > { %p1035_p3 = pnand %p1033_p12, %p1019_p1  ;;  %p1041_p13 = scmp.lt.s32.totalorder %s1039_s16, %s1032_s8 }
  0x85   : > { %p1036_p10 = pneg %p1035_p3  ;;  %p1042_p0 = por %p1041_p13, %p1040_p4 }
  0x87   : > { %p1043_p2 = pnand %p1042_p0, %p1036_p10 }
  0x89   : > { %1046 = shalt.err (!%p1043_p2)
}
  0x8a   : > { %834 = dma.hbm_to_vmem [thread:$0]  (!%p1356_p11), %s1350_s15, 64, %s1352_s30, %s224_s22  }
  0x8b   : > { %p1502_p8 = scmp.ne.s32.totalorder %s1493_s25, 0 }
  0x8c   : > { %s1388_s11 = sand.u32 (!%p1502_p8), 1, %s1113_s19  }
  0x8d   : > { %244 = sbr.rel (%p1502_p8) target bundleno = 700 (0x2bc), region = 40  ;;  %s781_s26 = sshll.u32 (!%p1502_p8), %s1388_s11, 2 }
  0x8e   : > { %s247_s29 = scalar_lea.sflag (!%p1502_p8), [#allocation3], %s1388_s11  ;;  %s250_s23 = scalar_lea.vmem (!%p1502_p8), [#allocation2], %s781_s26 }
  0x94   : > { %1092 = dma.done.wait (%p1331_p6), %s247_s29, 64  }
  0x95   : > { %1094 = vsyncadd (%p1331_p6), %s247_s29, 4294967232  ;;  %p1503_p4 = scmp.eq.s32.totalorder %s1193_s24, 0 }
  0x97   : > { %1096 = dma.done.wait (%p1503_p4), [#allocation6], 640   ;;  %p1504_p10 = pmov %p1503_p4 }
  0x98   : > { %p1505_p11 = pmov %p1503_p4 }
  0x99   : > { %1098 = vsyncadd (%p1504_p10), [#allocation6], 4294966656 }
  0x9a   : > { %1100 = dma.done.wait (%p1505_p11), [#allocation9], 160   ;;  %p1506_p1 = pmov %p1503_p4 }
  0x9b   : > { %v304_v0 = vlaneseq  ;;  %v1130_v1 = vmov 0   ;;  %v403_v3 = vld [vmem:[#allocation5 + $0x4] sm:$0xf]  ;;  %v339_v4 = vld [vmem:[#allocation5 + $0xc] sm:$0xf]  ;;  %v1131_v11 = vmov 0.0  }
  0x9c   : > { %1102 = vsyncadd (%p1506_p1), [#allocation9], 4294967136  ;;  %899 = vset.pattern.permute.xlu1 %v1130_v1  ;;  %898 = vset.pattern.permute.xlu0 %v1130_v1  ;;  %v429_v7 = vld [vmem:[#allocation5 + $0x10] sm:$0xf]  ;;  %v365_v9 = vld [vmem:[#allocation5 + $0x18] sm:$0xf] }
  0x9d   : > { %634 = vmatprep.mubr.bf16.mxu0 %v1130_v1  ;;  %v305_v2 = vshrl.u32 %v304_v0, 7  ;;  %406 = vperm.xlu1 %899, %v403_v3   ;;  %v294_v8 = vld [vmem:[#allocation10] sm:$0x3]  ;;  %v301_v10 = vld [vmem:[%s250_s23] sm:$0xf]  ;;  %s1132_s25 = smov 17  }
  0x9e   : > { %342 = vperm.xlu0 %898, %v339_v4   ;;  %vm295_vm0 = vcmp.lt.f32.partialorder %v294_v8, 15.0  ;;  %v302_v13 = vunpack.c.l.bf16 %v301_v10  ;;  %vm298_vm1 = vcmp.ge.f32.partialorder %v294_v8, 1.0  ;;  %v455_v16 = vld [vmem:[#allocation5 + $0x1c] sm:$0xf]  ;;  %v505_v25 = vld [vmem:[#allocation5 + $0x8] sm:$0xf] }
  0x9f   : > { %v306_v5 = vsub.s32 0, %v305_v2  ;;  %v310_v6 = vsub.s32 1, %v305_v2  ;;  %v787_v12 = vsel %vm295_vm0, 1.0, %v1131_v11  ;;  %v788_v19 = vsel %vm298_vm1, 1.0, %v1131_v11  ;;  %v531_v27 = vld [vmem:[#allocation5 + $0x14] sm:$0xf] }
  0xa0   : > { %v391_v18 = vcombine.high %v302_v13, %v302_v13  ;;  %v557_v29 = vld [vmem:[#allocation5 + $0x20] sm:$0xf]  ;;  %vm321_vm2 = vcmask 138240   ;;  %s1133_s7 = smov 112   ;;  %s1134_s15 = smov 96   ;;  %vm357_vm3 = vcmask 916480  }
  0xa1   : > { %v307_v14 = vrot.slane %v787_v12, %v306_v5  ;;  %v311_v15 = vrot.slane %v787_v12, %v310_v6  ;;  %432 = vperm.xlu1 %899, %v429_v7   ;;  %v484_v23 = vrot.slane %v788_v19, %v306_v5  ;;  %v488_v24 = vrot.slane %v788_v19, %v310_v6  ;;  %v328_v31 = vld [vmem:[#allocation5] sm:$0xf]  ;;  %s1135_s30 = smov 127   ;;  %s1136_s17 = smov 111  }
  0xa2   : > { %368 = vperm.xlu0 %898, %v365_v9   ;;  %v900_v21 = vpack.i.bf16 %v391_v18, %v302_v13  ;;  %s1137_s22 = smov 95   ;;  %s1138_s6 = smov 126   ;;  %vm383_vm4 = vcmask 785408   ;;  %vm421_vm5 = vcmask 1039360   ;;  %vm447_vm6 = vcmask 908288  }
  0xa3   : > { %v312_v17 = vcombine.low %v307_v14, %v311_v15  ;;  %v489_v26 = vcombine.low %v484_v23, %v488_v24  ;;  %s1139_s12 = smov 110   ;;  %s1140_s8 = smov 94   ;;  %v585_v15 = vld [vmem:[#allocation8] sm:$0xff]  ;;  %vm473_vm7 = vcmask 777216   ;;  %vm523_vm8 = vcmask 1031168  }
  0xa4   : > { %vm549_vm9 = vcmask 900096   ;;  %vm575_vm10 = vcmask 769024   ;;  %vm595_vm11 = vcmask 1041408   ;;  %vm591_vm12 = vcmask 31744   ;;  %s786_s13 = sshll.u32 %s1388_s11, 4  ;;  %s797_s14 = sshll.u32 %s1193_s24, 8 }
  0xa5   : > { %v314_v20 = vmul.f32 %v312_v17, %v302_v13  ;;  %v491_v28 = vmul.f32 %v489_v26, %v302_v13  ;;  %s292_s16 = scalar_lea.vmem [#allocation11], %s786_s13  ;;  %s648_s24 = scalar_lea.sflag [#allocation4], %s1388_s11 }
  0xa6   : > { %458 = vperm.xlu0 %898, %v455_v16   ;;  %s662_s26 = sshll.u32 %s292_s16, 4  ;;  %p1507_p5 = scmp.ne.s32.totalorder %s1499_s9, 0  ;;  %s1442_s26 = int_to_ptr.vmem [resolvable:$true] %s662_s26 }
  0xa7   : > { %317 = vrot.lane.b32.xlu1 %v314_v20, %s1132_s25  ;;  %v316_v22 = vcombine.high %v314_v20, %v314_v20  ;;  %v493_v30 = vcombine.high %v491_v28, %v491_v28 }
  0xaa   : > { %319 = vrot.lane.b32.xlu0 %v316_v22, %s1132_s25 }
  0xab   : > { %901 = vrot.lane.b32.xlu1 %v900_v21, %s1132_s25 }
  0xae   : > { %508 = vperm.xlu0 %898, %v505_v25  }
  0xaf   : > { %534 = vperm.xlu1 %899, %v531_v27  }
  0xb2   : > { %560 = vperm.xlu0 %898, %v557_v29  }
  0xb3   : > { %494 = vrot.lane.b32.xlu1 %v491_v28, %s1132_s25 }
  0xb6   : > { %496 = vrot.lane.b32.xlu0 %v493_v30, %s1132_s25  ;;  %s1440_s25 = scalar_lea.hbm %s1489_s5, %s797_s14 }
  0xb7   : > { %331 = vperm.xlu1 %899, %v328_v31  }
 0x11c   : > { %v407_v32 = vpop.permute.xlu1 %406 }
 0x11d   : > { %v343_v33 = vpop.permute.xlu0 %342 }
 0x120   : > { %v433_v34 = vpop.permute.xlu1 %432 }
 0x121   : > { %v369_v35 = vpop.permute.xlu0 %368 }
 0x124   : > { %v318_v37 = vpop.permute.xlu1 %317 }
 0x125   : > { %v459_v36 = vpop.permute.xlu0 %458  ;;  %v1405_v38 = vsel %vm321_vm2, 0.0, %v318_v37 }
 0x126   : > { %v345_v39 = vmul.f32 %v343_v33, %v1405_v38  ;;  %v371_v48 = vmul.f32 %v369_v35, %v1405_v38 }
 0x128   : > { %v902_v40 = vpop.permute.xlu1 %901  ;;  %351 = vrot.lane.b32.xlu0 %v345_v39, %s1133_s7 }
 0x129   : > { %v320_v41 = vpop.permute.xlu0 %319  ;;  %v903_v46 = vunpack.i.l.bf16 %v902_v40  ;;  %v904_v49 = vunpack.i.h.bf16 %v902_v40 }
 0x12a   : > { %v1409_v42 = vsel %vm321_vm2, %v318_v37, %v320_v41  ;;  %v327_v43 = vsel %vm321_vm2, %v320_v41, 0.0 }
 0x12b   : > { %v347_v44 = vmul.f32 %v343_v33, %v327_v43  ;;  %v346_v45 = vmul.f32 %v343_v33, %v1409_v42  ;;  %v372_v47 = vmul.f32 %v369_v35, %v1409_v42  ;;  %v400_v50 = vsel %vm321_vm2, 0.0, %v903_v46 }
 0x12c   : > { %v373_v51 = vmul.f32 %v369_v35, %v327_v43  ;;  %v409_v52 = vmul.f32 %v407_v32, %v400_v50  ;;  %v401_v53 = vsel %vm321_vm2, %v904_v49, 0.0  ;;  %v396_v54 = vsel %vm321_vm2, %v903_v46, %v904_v49 }
 0x12d   : > { %355 = vrot.lane.b32.xlu0 %v347_v44, %s1133_s7  ;;  %353 = vrot.lane.b32.xlu1 %v346_v45, %s1133_s7  ;;  %v509_v55 = vpop.permute.xlu0 %508  ;;  %v411_v56 = vmul.f32 %v407_v32, %v401_v53  ;;  %v410_v57 = vmul.f32 %v407_v32, %v396_v54  ;;  %v436_v60 = vmul.f32 %v433_v34, %v396_v54  ;;  %s1047_s7 = scalar_lea.vmem %s1442_s26, 256 }
 0x12e   : > { %v535_v58 = vpop.permute.xlu1 %534  ;;  %v435_v61 = vmul.f32 %v433_v34, %v400_v50  ;;  %v461_v62 = vmul.f32 %v459_v36, %v400_v50  ;;  %v437_v63 = vmul.f32 %v433_v34, %v401_v53  ;;  %v463_v2 = vmul.f32 %v459_v36, %v401_v53  ;;  %p1048_p6 = scmp.ne.s32.totalorder %s1442_s26, %s1047_s7 }
 0x12f   : > { %v462_v3 = vmul.f32 %v459_v36, %v396_v54 }
 0x130   : > { %p1049_p7 = pnand %p1048_p6, %p1507_p5 }
 0x131   : > { %379 = vrot.lane.b32.xlu0 %v372_v47, %s1134_s15  ;;  %377 = vrot.lane.b32.xlu1 %v371_v48, %s1134_s15  ;;  %v561_v59 = vpop.permute.xlu0 %560 }
 0x132   : > { %v495_v0 = vpop.permute.xlu1 %494  ;;  %p1050_p9 = pneg %p1049_p7 }
 0x133   : > { %v502_v4 = vsel %vm321_vm2, 0.0, %v495_v0 }
 0x134   : > { %v511_v6 = vmul.f32 %v509_v55, %v502_v4  ;;  %v537_v10 = vmul.f32 %v535_v58, %v502_v4  ;;  %v563_v13 = vmul.f32 %v561_v59, %v502_v4 }
 0x135   : > { %415 = vrot.lane.b32.xlu0 %v409_v52, %s1135_s30  ;;  %381 = vrot.lane.b32.xlu1 %v373_v51, %s1134_s15  ;;  %v497_v1 = vpop.permute.xlu0 %496  ;;  %s1141_s15 = smov [#allocation11]  }
 0x136   : > { %v498_v5 = vsel %vm321_vm2, %v495_v0, %v497_v1  ;;  %v503_v8 = vsel %vm321_vm2, %v497_v1, 0.0  ;;  %v332_v17 = vpop.permute.xlu1 %331 }
 0x137   : > { %v512_v7 = vmul.f32 %v509_v55, %v498_v5  ;;  %v513_v9 = vmul.f32 %v509_v55, %v503_v8  ;;  %v538_v11 = vmul.f32 %v535_v58, %v498_v5  ;;  %v539_v12 = vmul.f32 %v535_v58, %v503_v8 }
 0x138   : > { %v564_v14 = vmul.f32 %v561_v59, %v498_v5  ;;  %v565_v16 = vmul.f32 %v561_v59, %v503_v8  ;;  %v334_v34 = vmul.f32 %v332_v17, %v1405_v38  ;;  %v335_v43 = vmul.f32 %v332_v17, %v1409_v42 }
 0x139   : > { %419 = vrot.lane.b32.xlu0 %v411_v56, %s1135_s30  ;;  %417 = vrot.lane.b32.xlu1 %v410_v57, %s1135_s30  ;;  %s1051_s30 = sshll.u32 %s1141_s15, 4  ;;  %s1052_s30 = int_to_ptr.vmem [resolvable:$false] %s1051_s30 }
 0x13a   : > { %p1054_p12 = scmp.lt.s32.totalorder %s1442_s26, %s1052_s30 }
 0x13d   : > { %443 = vrot.lane.b32.xlu0 %v436_v60, %s1136_s17  ;;  %441 = vrot.lane.b32.xlu1 %v435_v61, %s1136_s17 }
 0x141   : > { %467 = vrot.lane.b32.xlu0 %v461_v62, %s1137_s22  ;;  %445 = vrot.lane.b32.xlu1 %v437_v63, %s1136_s17  ;;  %s1053_s17 = scalar_lea.vmem %s1052_s30, 512 }
 0x142   : > { %p1055_p3 = scmp.lt.s32.totalorder %s1053_s17, %s1047_s7 }
 0x144   : > { %p1056_p13 = por %p1055_p3, %p1054_p12 }
 0x145   : > { %471 = vrot.lane.b32.xlu0 %v463_v2, %s1137_s22  ;;  %469 = vrot.lane.b32.xlu1 %v462_v3, %s1137_s22 }
 0x146   : > { %p1057_p0 = pnand %p1056_p13, %p1050_p9 }
 0x149   : > { %517 = vrot.lane.b32.xlu1 %v511_v6, %s1138_s6  ;;  %519 = vrot.lane.b32.xlu0 %v512_v7, %s1138_s6 }
 0x14d   : > { %521 = vrot.lane.b32.xlu1 %v513_v9, %s1138_s6  ;;  %543 = vrot.lane.b32.xlu0 %v537_v10, %s1139_s12 }
 0x151   : > { %545 = vrot.lane.b32.xlu1 %v538_v11, %s1139_s12  ;;  %547 = vrot.lane.b32.xlu0 %v539_v12, %s1139_s12 }
 0x155   : > { %569 = vrot.lane.b32.xlu1 %v563_v13, %s1140_s8  ;;  %571 = vrot.lane.b32.xlu0 %v564_v14, %s1140_s8 }
 0x159   : > { %573 = vrot.lane.b32.xlu1 %v565_v16, %s1140_s8  ;;  %588 = vperm.xlu0 %898, %v585_v15   ;;  %v584_v15 = vld [vmem:[#allocation7] sm:$0xf] }
 0x19a   : > { %v352_v18 = vpop.permute.xlu0 %351 }
 0x19f   : > { %v354_v19 = vpop.permute.xlu1 %353  ;;  %v356_v20 = vpop.permute.xlu0 %355 }
 0x1a0   : > { %v358_v33 = vsel %vm357_vm3, %v352_v18, %v354_v19  ;;  %v359_v40 = vsel %vm357_vm3, %v354_v19, %v356_v20 }
 0x1a1   : > { %v362_v36 = vadd.f32 %v358_v33, %v334_v34  ;;  %v363_v47 = vadd.f32 %v359_v40, %v335_v43 }
 0x1a3   : > { %v378_v21 = vpop.permute.xlu1 %377  ;;  %v380_v22 = vpop.permute.xlu0 %379 }
 0x1a4   : > { %v384_v35 = vsel %vm383_vm4, %v378_v21, %v380_v22 }
 0x1a5   : > { %v388_v44 = vadd.f32 %v384_v35, %v362_v36 }
 0x1a7   : > { %v382_v23 = vpop.permute.xlu1 %381  ;;  %v416_v24 = vpop.permute.xlu0 %415 }
 0x1a8   : > { %v385_v45 = vsel %vm383_vm4, %v380_v22, %v382_v23 }
 0x1a9   : > { %v389_v52 = vadd.f32 %v385_v45, %v363_v47 }
 0x1ab   : > { %v418_v25 = vpop.permute.xlu1 %417  ;;  %v420_v26 = vpop.permute.xlu0 %419 }
 0x1ac   : > { %v422_v41 = vsel %vm421_vm5, %v416_v24, %v418_v25  ;;  %v423_v50 = vsel %vm421_vm5, %v418_v25, %v420_v26 }
 0x1ad   : > { %v426_v38 = vadd.f32 %v422_v41, %v388_v44  ;;  %v427_v55 = vadd.f32 %v423_v50, %v389_v52 }
 0x1af   : > { %v442_v27 = vpop.permute.xlu1 %441  ;;  %v444_v28 = vpop.permute.xlu0 %443 }
 0x1b0   : > { %v448_v46 = vsel %vm447_vm6, %v442_v27, %v444_v28 }
 0x1b1   : > { %v452_v53 = vadd.f32 %v448_v46, %v426_v38 }
 0x1b3   : > { %v446_v29 = vpop.permute.xlu1 %445  ;;  %v468_v30 = vpop.permute.xlu0 %467 }
 0x1b4   : > { %v449_v42 = vsel %vm447_vm6, %v444_v28, %v446_v29 }
 0x1b5   : > { %v453_v61 = vadd.f32 %v449_v42, %v427_v55 }
 0x1b7   : > { %v470_v31 = vpop.permute.xlu1 %469  ;;  %v472_v32 = vpop.permute.xlu0 %471 }
 0x1b8   : > { %v474_v51 = vsel %vm473_vm7, %v468_v30, %v470_v31  ;;  %v475_v59 = vsel %vm473_vm7, %v470_v31, %v472_v32 }
 0x1b9   : > { %v478_v56 = vadd.f32 %v474_v51, %v452_v53  ;;  %v479_v0 = vadd.f32 %v475_v59, %v453_v61 }
 0x1bb   : > { %v518_v37 = vpop.permute.xlu1 %517  ;;  %v520_v39 = vpop.permute.xlu0 %519 }
 0x1bc   : > { %v524_v54 = vsel %vm523_vm8, %v518_v37, %v520_v39 }
 0x1bd   : > { %v528_v62 = vadd.f32 %v524_v54, %v478_v56 }
 0x1bf   : > { %v522_v48 = vpop.permute.xlu1 %521  ;;  %v544_v49 = vpop.permute.xlu0 %543 }
 0x1c0   : > { %v525_v63 = vsel %vm523_vm8, %v520_v39, %v522_v48 }
 0x1c1   : > { %v529_v6 = vadd.f32 %v525_v63, %v479_v0 }
 0x1c3   : > { %v546_v57 = vpop.permute.xlu1 %545  ;;  %v548_v58 = vpop.permute.xlu0 %547 }
 0x1c4   : > { %v550_v60 = vsel %vm549_vm9, %v544_v49, %v546_v57  ;;  %v551_v4 = vsel %vm549_vm9, %v546_v57, %v548_v58 }
 0x1c5   : > { %v554_v1 = vadd.f32 %v550_v60, %v528_v62  ;;  %v555_v8 = vadd.f32 %v551_v4, %v529_v6 }
 0x1c7   : > { %v570_v2 = vpop.permute.xlu1 %569  ;;  %v572_v3 = vpop.permute.xlu0 %571 }
 0x1c8   : > { %v576_v5 = vsel %vm575_vm10, %v570_v2, %v572_v3 }
 0x1c9   : > { %v580_v7 = vadd.f32 %v576_v5, %v554_v1 }
 0x1cb   : > { %v574_v9 = vpop.permute.xlu1 %573  ;;  %v582_v12 = vpack.c.bf16 %v580_v7, %v580_v7 }
 0x1cc   : > { %v577_v10 = vsel %vm575_vm10, %v572_v3, %v574_v9 }
 0x1cd   : > { %v581_v11 = vadd.f32 %v577_v10, %v555_v8  ;;  %v597_v14 = vsel %vm595_vm11, %v582_v12, 0 }
 0x1cf   : > { %v583_v13 = vpack.c.bf16 %v581_v11, %v581_v11 }
 0x1d1   : > { %789 = vmatprep.subr.msk.bf16.mxu0 %vm595_vm11, %v583_v13 }
 0x1d2   : > { %603 = vmatpush1.bf16.msra.mxu0 %v597_v14 }
 0x1d5   : > { %790 = vmatmul.mubr.msk.bf16.vlgmr.msra.gmra.mrb[0].mxu0 %vm591_vm12, %v584_v15 }
 0x1d8   : > { %v589_v16 = vpop.permute.xlu0 %588 }
 0x2a8   : > { %v636_v17 = vpop.f32.mrb[0].mxu0 }
 0x2a9   : > { %v637_v18 = vadd.f32 %v636_v17, %v589_v16  ;;  %v638_v19 = vpop.f32.mrb[1].mxu0 }
 0x2aa   : > { %v639_v20 = vadd.f32 %v638_v19, %v589_v16  ;;  %v640_v21 = vpop.f32.mrb[2].mxu0 }
 0x2ab   : > { %v643_v22 = vmax.f32 %v637_v18, 0.0  ;;  %v641_v23 = vpop.f32.mrb[3].mxu0 }
 0x2ac   : > { %v644_v24 = vmax.f32 %v639_v20, 0.0 }
 0x2ad   : > { %645 = vst [vmem:[%s292_s16] sm:$0xff] %v643_v22 }
 0x2ae   : > { %646 = vst [vmem:[%s292_s16 + $0x8] sm:$0xff] %v644_v24 }
 0x2af   : > { %1060 = shalt.err (!%p1057_p0)
}
 0x2b0   : > { %s1061_s11 = scalar_lea.hbm %s1440_s25, 256  ;;  %s1065_s12 = scalar_lea.hbm %s1489_s5, 512 }
 0x2b1   : > { %p1062_p2 = scmp.ne.s32.totalorder %s1440_s25, %s1061_s11  ;;  %p1066_p10 = scmp.lt.u32.totalorder %s1440_s25, %s1489_s5 }
 0x2b2   : > { %p1067_p11 = scmp.lt.u32.totalorder %s1065_s12, %s1061_s11  ;;  %p1069_p6 = scmp.lt.u32.totalorder %s1061_s11, %s1440_s25 }
 0x2b3   : > { %p1063_p8 = pnand %p1062_p2, %p1507_p5 }
 0x2b4   : > { %p1068_p1 = por %p1067_p11, %p1066_p10 }
 0x2b5   : > { %p1064_p4 = pneg %p1063_p8 }
 0x2b6   : > { %p1070_p7 = por %p1069_p6, %p1068_p1 }
 0x2b8   : > { %p1071_p9 = pnand %p1070_p7, %p1064_p4 }
 0x2ba   : > { %1074 = shalt.err (!%p1071_p9)
}
 0x2bb   : > { %816 = dma.vmem_to_hbm [thread:$0]  (%p1507_p5), %s1442_s26, 256, %s1440_s25, %s648_s24  }
 0x2bc PF: > { %s674_s14 = sand.u32 1, %s1109_s18   ;;  %p1508_p12 = scmp.ne.s32.totalorder %s1500_s10, 0 }
 0x2bd   : > { %p1509_p3 = scmp.ge.s32.totalorder %s1121_s21, 2  ;;  %s675_s16 = scalar_lea.sflag [#allocation4], %s674_s14 }
 0x2bf   : > { %p836_p13 = pnand %p1509_p3, %p1508_p12 }
 0x2c1   : > { %1104 = dma.done.wait (!%p836_p13), %s675_s16, 256  }
 0x2c2   : > { %1106 = vsyncadd (!%p836_p13), %s675_s16, 4294967040  ;;  %p20_p0 = scmp.ge.s32.totalorder %s1312_s28, 4   ;;  %s1510_s18 = smov %s1113_s19 }
 0x2c3   : > { %s1511_s19 = smov %s1117_s20  ;;  %s1512_s20 = smov %s1323_s27 }
 0x2c4   : > { %s1513_s21 = smov %s1312_s28  ;;  %22 = sbr.rel (!%p20_p0) target bundleno = 7 (0x7), region = 109 }
 0x2cb   :  { %680 = vsyncpa [#allocation3], 1 }
 0x2cc   :  { %682 = vsyncpa [#allocation3 + $0x1], 1 }
 0x2cd   :  { %683 = vsyncpa [#allocation6], 1 }
 0x2ce   :  { %684 = vsyncpa [#allocation9], 1 }
 0x2cf   :  { %685 = vsyncpa [#allocation4], 1 }
 0x2d0   :  { %687 = vsyncpa [#allocation4 + $0x1], 1 }

</bundles_post_ra>
